<compile_context>
chip_gen: v5e
topology: v5e:2x2
jax: 0.10.0
libtpu: 0.0.40
codegen_flags: <defaults>
</compile_context>

<pallas_src>
import jax
import jax.numpy as jnp
from jax.experimental import pallas as pl
from jax.experimental.pallas import tpu as pltpu


# ------------------------------- kernel --------------------------------------
def _spm_kernel(rgb_ref, depth_ref, w_ref, b_ref, wcon_ref, bcon_ref, o_ref):
    """Fused SPM forward on one (1, C, TILE) block.

    rgb_ref, depth_ref : (1, C, TILE) bf16 channels-first activations
    w_ref              : (6, C, C)  f32 1x1 conv weights [rgb1,rgb2,rgb3,d1,d2,d3]
    b_ref              : (6, C, 1)  f32 matching biases
    wcon_ref           : (3, C, C)  f32 fusing `con` weight split along its 3C input axis
    bcon_ref           : (C, 1)     f32 fusing `con` bias
    o_ref              : (1, C, TILE) bf16 sigmoid saliency output
    """
    f32 = jnp.float32

    def conv_relu(idx, x):
        y = jnp.dot(w_ref[idx], x, preferred_element_type=f32) + b_ref[idx]
        return jnp.maximum(y, 0.0)

    x_rgb = rgb_ref[0].astype(f32)      # (C, TILE)
    x_dep = depth_ref[0].astype(f32)    # (C, TILE)

    # Stage 1:  fr1 = relu(conv(rgb)),  fd1 = relu(conv(depth))
    fr = conv_relu(0, x_rgb)
    fd = conv_relu(3, x_dep)
    sal = jnp.dot(wcon_ref[0], fr + fd, preferred_element_type=f32) + bcon_ref[...]

    # Stage 2:  fr2 = fr1 + relu(conv(fr1)),  fd2 = relu(conv(fd1))
    fr = fr + conv_relu(1, fr)
    fd = conv_relu(4, fd)
    sal = sal + jnp.dot(wcon_ref[1], fr + fd, preferred_element_type=f32)

    # Stage 3:  fr3 = fr2 + relu(conv(fr2)),  fd3 = relu(conv(fd2))
    fr = fr + conv_relu(2, fr)
    fd = conv_relu(5, fd)
    sal = sal + jnp.dot(wcon_ref[2], fr + fd, preferred_element_type=f32)

    # Numerically stable sigmoid: exp on EUP, approx reciprocal on EUP.
    z = jnp.exp(-jnp.abs(sal))
    r = pl.reciprocal(1.0 + z, approx=True)
    out = jnp.where(sal >= 0.0, r, z * r)
    o_ref[0] = out.astype(o_ref.dtype)


# ----------------------------- tiling helpers ---------------------------------
def _round_up(x, m):
    return (x + m - 1) // m * m


def _cdiv(a, b):
    return -(-a // b)


def _vmem_capacity_bytes():
    """Physical VMEM per TensorCore (128 MiB v5e/v6e, 64 MiB v7x)."""
    try:
        return int(pltpu.get_tpu_info().vmem_capacity_bytes)
    except Exception:
        return 64 * 1024 * 1024  # conservative (v7x) fallback


def _choose_tile(n, hw, c, tile_budget):
    """Pick a 128-multiple spatial tile and the padded H*W it divides.

    Per lane of tile we need roughly:
      * pipelined bf16 I/O: 3 arrays x 2 buffers x C x 2 B  = 12*C bytes
      * in-kernel f32 temporaries (~5 CxTILE tiles)         = 20*C bytes
    -> ~36*C bytes/lane (conservative, includes slack).
    """
    bytes_per_lane = 36 * c
    cap = max(512, (tile_budget // bytes_per_lane) // 128 * 128)
    hw128 = _round_up(hw, 128)
    tile = min(cap, hw128)
    # Keep a few grid steps for megacore sharding / pipeline overlap, but never
    # drop below 512 lanes (lane-dense stores, step-overhead amortization).
    while tile > 512 and n * _cdiv(hw128, tile) < 4:
        tile = _round_up(tile // 2, 128)
    hw_pad = _round_up(hw, tile)
    return tile, hw_pad


# ------------------------------- wrapper --------------------------------------
@jax.jit
def spm_forward(rgb, depth,
                w_r1, b_r1, w_r2, b_r2, w_r3, b_r3,
                w_d1, b_d1, w_d2, b_d2, w_d3, b_d3,
                w_con, b_con):
    """SPM forward. rgb/depth: (N, C, H, W) -> bf16 sigmoid saliency (N, C, H, W)."""
    N, C, H, W = rgb.shape
    for w in (w_r1, w_r2, w_r3, w_d1, w_d2, w_d3):
        assert w.shape == (C, C, 1, 1), "SPM forward requires input_dim == output_dim"
    assert w_con.shape == (C, 3 * C, 1, 1)
    assert depth.shape == rgb.shape

    HW = H * W
    phys_vmem = _vmem_capacity_bytes()
    vmem_limit = min(int(phys_vmem * 3 // 4), 100 * 1024 * 1024)   # ~96 MiB v5e/v6e, ~48 MiB v7x
    TL, HW_pad = _choose_tile(N, HW, C, tile_budget=int(vmem_limit * 0.6))
    grid = (N, HW_pad // TL)

    # Free (contiguous) reshapes; bf16 stream for the HBM-bound activations.
    x_rgb = rgb.reshape(N, C, HW).astype(jnp.bfloat16)
    x_dep = depth.reshape(N, C, HW).astype(jnp.bfloat16)
    if HW_pad != HW:
        pad = ((0, 0), (0, 0), (0, HW_pad - HW))
        x_rgb = jnp.pad(x_rgb, pad)
        x_dep = jnp.pad(x_dep, pad)

    # Weights stay f32 (tiny; all in-kernel math is f32).
    w_stack = jnp.stack(
        [w.reshape(C, C) for w in (w_r1, w_r2, w_r3, w_d1, w_d2, w_d3)]
    ).astype(jnp.float32)                                            # (6, C, C)
    b_stack = jnp.stack(
        [b.reshape(C, 1) for b in (b_r1, b_r2, b_r3, b_d1, b_d2, b_d3)]
    ).astype(jnp.float32)                                            # (6, C, 1)
    # Split the fusing conv weight along its 3C input axis: wc[j] @ (fr_j + fd_j).
    wc = w_con.reshape(C, 3, C).transpose(1, 0, 2).astype(jnp.float32)   # (3, C, C)
    bc = b_con.reshape(C, 1).astype(jnp.float32)

    out = pl.pallas_call(
        _spm_kernel,
        out_shape=jax.ShapeDtypeStruct((N, C, HW_pad), jnp.bfloat16),
        grid=grid,
        in_specs=[
            pl.BlockSpec((1, C, TL), lambda n, t: (n, 0, t)),
            pl.BlockSpec((1, C, TL), lambda n, t: (n, 0, t)),
            pl.BlockSpec((6, C, C), lambda n, t: (0, 0, 0)),
            pl.BlockSpec((6, C, 1), lambda n, t: (0, 0, 0)),
            pl.BlockSpec((3, C, C), lambda n, t: (0, 0, 0)),
            pl.BlockSpec((C, 1), lambda n, t: (0, 0)),
        ],
        out_specs=pl.BlockSpec((1, C, TL), lambda n, t: (n, 0, t)),
        compiler_params=pltpu.CompilerParams(
            dimension_semantics=("parallel", "parallel"),
            vmem_limit_bytes=vmem_limit,
        ),
    )(x_rgb, x_dep, w_stack, b_stack, wc, bc)

    if HW_pad != HW:
        out = out[:, :, :HW]
    return out.reshape(N, C, H, W)


# ----------------------------- pure-JAX reference -----------------------------
def _conv1x1_ref(x, w, b):
    y = jnp.einsum('nchw,oc->nohw', x, w[:, :, 0, 0],
                   precision=jax.lax.Precision.HIGHEST)
    return y + b[None, :, None, None]


def spm_reference(rgb, depth,
                  w_r1, b_r1, w_r2, b_r2, w_r3, b_r3,
                  w_d1, b_d1, w_d2, b_d2, w_d3, b_d3,
                  w_con, b_con):
    relu = jax.nn.relu
    fr1 = relu(_conv1x1_ref(rgb, w_r1, b_r1))
    fr2 = fr1 + relu(_conv1x1_ref(fr1, w_r2, b_r2))
    fr3 = fr2 + relu(_conv1x1_ref(fr2, w_r3, b_r3))
    fd1 = relu(_conv1x1_ref(depth, w_d1, b_d1))
    fd2 = relu(_conv1x1_ref(fd1, w_d2, b_d2))
    fd3 = relu(_conv1x1_ref(fd2, w_d3, b_d3))
    fuse = (jnp.concatenate([fr1, fr2, fr3], axis=1)
            + jnp.concatenate([fd1, fd2, fd3], axis=1))
    return jax.nn.sigmoid(_conv1x1_ref(fuse, w_con, b_con))


if __name__ == "__main__":
    key = jax.random.PRNGKey(0)
    N, C, H, W = 2, 8, 16, 16          # input_dim == output_dim (required by SPM.forward)

    keys = jax.random.split(key, 9)
    rgb = jax.random.normal(keys[0], (N, C, H, W), jnp.float32)
    depth = jax.random.normal(keys[1], (N, C, H, W), jnp.float32)

    def make_conv(k, cin, cout):
        kw, kb = jax.random.split(k)
        bound = 1.0 / (cin ** 0.5)     # PyTorch Conv2d default init range for a 1x1 kernel
        w = jax.random.uniform(kw, (cout, cin, 1, 1), jnp.float32, -bound, bound)
        b = jax.random.uniform(kb, (cout,), jnp.float32, -bound, bound)
        return w, b

    w_r1, b_r1 = make_conv(keys[2], C, C)
    w_r2, b_r2 = make_conv(keys[3], C, C)
    w_r3, b_r3 = make_conv(keys[4], C, C)
    w_d1, b_d1 = make_conv(keys[5], C, C)
    w_d2, b_d2 = make_conv(keys[6], C, C)
    w_d3, b_d3 = make_conv(keys[7], C, C)
    w_con, b_con = make_conv(keys[8], 3 * C, C)

    args = (rgb, depth,
            w_r1, b_r1, w_r2, b_r2, w_r3, b_r3,
            w_d1, b_d1, w_d2, b_d2, w_d3, b_d3,
            w_con, b_con)

    out = jax.block_until_ready(spm_forward(*args))
    ref = jax.block_until_ready(spm_reference(*args))

    assert out.shape == (N, C, H, W)
    assert out.dtype == jnp.bfloat16
    out_f32 = out.astype(jnp.float32)
    assert bool(jnp.all((out_f32 >= 0.0) & (out_f32 <= 1.0)))           # sigmoid range
    # bf16 activation/output stream -> small quantization error vs. f32 reference.
    assert bool(jnp.allclose(out_f32, ref, rtol=2e-2, atol=2e-2)), (
        float(jnp.max(jnp.abs(out_f32 - ref))))
    print("KERNEL_OK")
</pallas_src>

<mosaic_0001>
module attributes {stable_mosaic.version = 11 : i64} {
  func.func @_spm_kernel(%arg0: i32, %arg1: i32, %arg2: memref<1x8x256xbf16, #tpu.memory_space<vmem>>, %arg3: memref<1x8x256xbf16, #tpu.memory_space<vmem>>, %arg4: memref<6x8x8xf32, #tpu.memory_space<vmem>>, %arg5: memref<6x8x1xf32, #tpu.memory_space<vmem>>, %arg6: memref<3x8x8xf32, #tpu.memory_space<vmem>>, %arg7: memref<8x1xf32, #tpu.memory_space<vmem>>, %arg8: memref<1x8x256xbf16, #tpu.memory_space<vmem>>) attributes {dimension_semantics = [#tpu.dimension_semantics<parallel>, #tpu.dimension_semantics<parallel>], iteration_bounds = array<i64: 2, 1>, scalar_prefetch = 0 : i64, scratch_operands = 0 : i64, tpu.core_type = #tpu.core_type<tc>, window_params = [{transform_indices = @transform_0, window_bounds = array<i64: 1, 8, 256>}, {transform_indices = @transform_1, window_bounds = array<i64: 1, 8, 256>}, {pipeline_mode = #tpu.pipeline_mode<synchronous>, transform_indices = @transform_2, window_bounds = array<i64: 6, 8, 8>}, {pipeline_mode = #tpu.pipeline_mode<synchronous>, transform_indices = @transform_3, window_bounds = array<i64: 6, 8, 1>}, {pipeline_mode = #tpu.pipeline_mode<synchronous>, transform_indices = @transform_4, window_bounds = array<i64: 3, 8, 8>}, {pipeline_mode = #tpu.pipeline_mode<synchronous>, transform_indices = @transform_5, window_bounds = array<i64: 8, 1>}, {transform_indices = @transform_6, window_bounds = array<i64: 1, 8, 256>}]} {
    %c0 = arith.constant 0 : index
    %c0_0 = arith.constant 0 : index
    %c0_1 = arith.constant 0 : index
    %0 = vector.load %arg2[%c0, %c0_0, %c0_1] : memref<1x8x256xbf16, #tpu.memory_space<vmem>>, vector<1x8x256xbf16>
    %1 = vector.shape_cast %0 : vector<1x8x256xbf16> to vector<8x256xbf16>
    %2 = arith.extf %1 : vector<8x256xbf16> to vector<8x256xf32>
    %c0_2 = arith.constant 0 : index
    %c0_3 = arith.constant 0 : index
    %c0_4 = arith.constant 0 : index
    %3 = vector.load %arg3[%c0_2, %c0_3, %c0_4] : memref<1x8x256xbf16, #tpu.memory_space<vmem>>, vector<1x8x256xbf16>
    %4 = vector.shape_cast %3 : vector<1x8x256xbf16> to vector<8x256xbf16>
    %5 = arith.extf %4 : vector<8x256xbf16> to vector<8x256xf32>
    %c0_5 = arith.constant 0 : index
    %c0_6 = arith.constant 0 : index
    %c0_7 = arith.constant 0 : index
    %6 = vector.load %arg4[%c0_5, %c0_6, %c0_7] : memref<6x8x8xf32, #tpu.memory_space<vmem>>, vector<1x8x8xf32>
    %7 = vector.shape_cast %6 : vector<1x8x8xf32> to vector<8x8xf32>
    %cst = arith.constant dense<0.000000e+00> : vector<8x256xf32>
    %8 = tpu.matmul %7, %2, %cst {dimension_numbers = #tpu.dot_dimension_numbers<[1], [0], [0], [1], [0, 0, 1, 1], [], []>} : vector<8x8xf32>, vector<8x256xf32>, vector<8x256xf32> -> vector<8x256xf32>
    %c0_8 = arith.constant 0 : index
    %c0_9 = arith.constant 0 : index
    %c0_10 = arith.constant 0 : index
    %9 = vector.load %arg5[%c0_8, %c0_9, %c0_10] : memref<6x8x1xf32, #tpu.memory_space<vmem>>, vector<1x8x1xf32>
    %10 = vector.shape_cast %9 : vector<1x8x1xf32> to vector<8x1xf32>
    %11 = vector.broadcast %10 : vector<8x1xf32> to vector<8x256xf32>
    %12 = arith.addf %8, %11 : vector<8x256xf32>
    %cst_11 = arith.constant 0.000000e+00 : f32
    %13 = vector.broadcast %cst_11 : f32 to vector<8x256xf32>
    %14 = arith.maximumf %12, %13 : vector<8x256xf32>
    %c3 = arith.constant 3 : index
    %c0_12 = arith.constant 0 : index
    %c0_13 = arith.constant 0 : index
    %15 = vector.load %arg4[%c3, %c0_12, %c0_13] : memref<6x8x8xf32, #tpu.memory_space<vmem>>, vector<1x8x8xf32>
    %16 = vector.shape_cast %15 : vector<1x8x8xf32> to vector<8x8xf32>
    %cst_14 = arith.constant dense<0.000000e+00> : vector<8x256xf32>
    %17 = tpu.matmul %16, %5, %cst_14 {dimension_numbers = #tpu.dot_dimension_numbers<[1], [0], [0], [1], [0, 0, 1, 1], [], []>} : vector<8x8xf32>, vector<8x256xf32>, vector<8x256xf32> -> vector<8x256xf32>
    %c3_15 = arith.constant 3 : index
    %c0_16 = arith.constant 0 : index
    %c0_17 = arith.constant 0 : index
    %18 = vector.load %arg5[%c3_15, %c0_16, %c0_17] : memref<6x8x1xf32, #tpu.memory_space<vmem>>, vector<1x8x1xf32>
    %19 = vector.shape_cast %18 : vector<1x8x1xf32> to vector<8x1xf32>
    %20 = vector.broadcast %19 : vector<8x1xf32> to vector<8x256xf32>
    %21 = arith.addf %17, %20 : vector<8x256xf32>
    %cst_18 = arith.constant 0.000000e+00 : f32
    %22 = vector.broadcast %cst_18 : f32 to vector<8x256xf32>
    %23 = arith.maximumf %21, %22 : vector<8x256xf32>
    %c0_19 = arith.constant 0 : index
    %c0_20 = arith.constant 0 : index
    %c0_21 = arith.constant 0 : index
    %24 = vector.load %arg6[%c0_19, %c0_20, %c0_21] : memref<3x8x8xf32, #tpu.memory_space<vmem>>, vector<1x8x8xf32>
    %25 = vector.shape_cast %24 : vector<1x8x8xf32> to vector<8x8xf32>
    %26 = arith.addf %14, %23 : vector<8x256xf32>
    %cst_22 = arith.constant dense<0.000000e+00> : vector<8x256xf32>
    %27 = tpu.matmul %25, %26, %cst_22 {dimension_numbers = #tpu.dot_dimension_numbers<[1], [0], [0], [1], [0, 0, 1, 1], [], []>} : vector<8x8xf32>, vector<8x256xf32>, vector<8x256xf32> -> vector<8x256xf32>
    %c0_23 = arith.constant 0 : index
    %c0_24 = arith.constant 0 : index
    %28 = vector.load %arg7[%c0_23, %c0_24] : memref<8x1xf32, #tpu.memory_space<vmem>>, vector<8x1xf32>
    %29 = vector.broadcast %28 : vector<8x1xf32> to vector<8x256xf32>
    %30 = arith.addf %27, %29 : vector<8x256xf32>
    %c1 = arith.constant 1 : index
    %c0_25 = arith.constant 0 : index
    %c0_26 = arith.constant 0 : index
    %31 = vector.load %arg4[%c1, %c0_25, %c0_26] : memref<6x8x8xf32, #tpu.memory_space<vmem>>, vector<1x8x8xf32>
    %32 = vector.shape_cast %31 : vector<1x8x8xf32> to vector<8x8xf32>
    %cst_27 = arith.constant dense<0.000000e+00> : vector<8x256xf32>
    %33 = tpu.matmul %32, %14, %cst_27 {dimension_numbers = #tpu.dot_dimension_numbers<[1], [0], [0], [1], [0, 0, 1, 1], [], []>} : vector<8x8xf32>, vector<8x256xf32>, vector<8x256xf32> -> vector<8x256xf32>
    %c1_28 = arith.constant 1 : index
    %c0_29 = arith.constant 0 : index
    %c0_30 = arith.constant 0 : index
    %34 = vector.load %arg5[%c1_28, %c0_29, %c0_30] : memref<6x8x1xf32, #tpu.memory_space<vmem>>, vector<1x8x1xf32>
    %35 = vector.shape_cast %34 : vector<1x8x1xf32> to vector<8x1xf32>
    %36 = vector.broadcast %35 : vector<8x1xf32> to vector<8x256xf32>
    %37 = arith.addf %33, %36 : vector<8x256xf32>
    %cst_31 = arith.constant 0.000000e+00 : f32
    %38 = vector.broadcast %cst_31 : f32 to vector<8x256xf32>
    %39 = arith.maximumf %37, %38 : vector<8x256xf32>
    %40 = arith.addf %14, %39 : vector<8x256xf32>
    %c4 = arith.constant 4 : index
    %c0_32 = arith.constant 0 : index
    %c0_33 = arith.constant 0 : index
    %41 = vector.load %arg4[%c4, %c0_32, %c0_33] : memref<6x8x8xf32, #tpu.memory_space<vmem>>, vector<1x8x8xf32>
    %42 = vector.shape_cast %41 : vector<1x8x8xf32> to vector<8x8xf32>
    %cst_34 = arith.constant dense<0.000000e+00> : vector<8x256xf32>
    %43 = tpu.matmul %42, %23, %cst_34 {dimension_numbers = #tpu.dot_dimension_numbers<[1], [0], [0], [1], [0, 0, 1, 1], [], []>} : vector<8x8xf32>, vector<8x256xf32>, vector<8x256xf32> -> vector<8x256xf32>
    %c4_35 = arith.constant 4 : index
    %c0_36 = arith.constant 0 : index
    %c0_37 = arith.constant 0 : index
    %44 = vector.load %arg5[%c4_35, %c0_36, %c0_37] : memref<6x8x1xf32, #tpu.memory_space<vmem>>, vector<1x8x1xf32>
    %45 = vector.shape_cast %44 : vector<1x8x1xf32> to vector<8x1xf32>
    %46 = vector.broadcast %45 : vector<8x1xf32> to vector<8x256xf32>
    %47 = arith.addf %43, %46 : vector<8x256xf32>
    %cst_38 = arith.constant 0.000000e+00 : f32
    %48 = vector.broadcast %cst_38 : f32 to vector<8x256xf32>
    %49 = arith.maximumf %47, %48 : vector<8x256xf32>
    %c1_39 = arith.constant 1 : index
    %c0_40 = arith.constant 0 : index
    %c0_41 = arith.constant 0 : index
    %50 = vector.load %arg6[%c1_39, %c0_40, %c0_41] : memref<3x8x8xf32, #tpu.memory_space<vmem>>, vector<1x8x8xf32>
    %51 = vector.shape_cast %50 : vector<1x8x8xf32> to vector<8x8xf32>
    %52 = arith.addf %40, %49 : vector<8x256xf32>
    %cst_42 = arith.constant dense<0.000000e+00> : vector<8x256xf32>
    %53 = tpu.matmul %51, %52, %cst_42 {dimension_numbers = #tpu.dot_dimension_numbers<[1], [0], [0], [1], [0, 0, 1, 1], [], []>} : vector<8x8xf32>, vector<8x256xf32>, vector<8x256xf32> -> vector<8x256xf32>
    %54 = arith.addf %30, %53 : vector<8x256xf32>
    %c2 = arith.constant 2 : index
    %c0_43 = arith.constant 0 : index
    %c0_44 = arith.constant 0 : index
    %55 = vector.load %arg4[%c2, %c0_43, %c0_44] : memref<6x8x8xf32, #tpu.memory_space<vmem>>, vector<1x8x8xf32>
    %56 = vector.shape_cast %55 : vector<1x8x8xf32> to vector<8x8xf32>
    %cst_45 = arith.constant dense<0.000000e+00> : vector<8x256xf32>
    %57 = tpu.matmul %56, %40, %cst_45 {dimension_numbers = #tpu.dot_dimension_numbers<[1], [0], [0], [1], [0, 0, 1, 1], [], []>} : vector<8x8xf32>, vector<8x256xf32>, vector<8x256xf32> -> vector<8x256xf32>
    %c2_46 = arith.constant 2 : index
    %c0_47 = arith.constant 0 : index
    %c0_48 = arith.constant 0 : index
    %58 = vector.load %arg5[%c2_46, %c0_47, %c0_48] : memref<6x8x1xf32, #tpu.memory_space<vmem>>, vector<1x8x1xf32>
    %59 = vector.shape_cast %58 : vector<1x8x1xf32> to vector<8x1xf32>
    %60 = vector.broadcast %59 : vector<8x1xf32> to vector<8x256xf32>
    %61 = arith.addf %57, %60 : vector<8x256xf32>
    %cst_49 = arith.constant 0.000000e+00 : f32
    %62 = vector.broadcast %cst_49 : f32 to vector<8x256xf32>
    %63 = arith.maximumf %61, %62 : vector<8x256xf32>
    %64 = arith.addf %40, %63 : vector<8x256xf32>
    %c5 = arith.constant 5 : index
    %c0_50 = arith.constant 0 : index
    %c0_51 = arith.constant 0 : index
    %65 = vector.load %arg4[%c5, %c0_50, %c0_51] : memref<6x8x8xf32, #tpu.memory_space<vmem>>, vector<1x8x8xf32>
    %66 = vector.shape_cast %65 : vector<1x8x8xf32> to vector<8x8xf32>
    %cst_52 = arith.constant dense<0.000000e+00> : vector<8x256xf32>
    %67 = tpu.matmul %66, %49, %cst_52 {dimension_numbers = #tpu.dot_dimension_numbers<[1], [0], [0], [1], [0, 0, 1, 1], [], []>} : vector<8x8xf32>, vector<8x256xf32>, vector<8x256xf32> -> vector<8x256xf32>
    %c5_53 = arith.constant 5 : index
    %c0_54 = arith.constant 0 : index
    %c0_55 = arith.constant 0 : index
    %68 = vector.load %arg5[%c5_53, %c0_54, %c0_55] : memref<6x8x1xf32, #tpu.memory_space<vmem>>, vector<1x8x1xf32>
    %69 = vector.shape_cast %68 : vector<1x8x1xf32> to vector<8x1xf32>
    %70 = vector.broadcast %69 : vector<8x1xf32> to vector<8x256xf32>
    %71 = arith.addf %67, %70 : vector<8x256xf32>
    %cst_56 = arith.constant 0.000000e+00 : f32
    %72 = vector.broadcast %cst_56 : f32 to vector<8x256xf32>
    %73 = arith.maximumf %71, %72 : vector<8x256xf32>
    %c2_57 = arith.constant 2 : index
    %c0_58 = arith.constant 0 : index
    %c0_59 = arith.constant 0 : index
    %74 = vector.load %arg6[%c2_57, %c0_58, %c0_59] : memref<3x8x8xf32, #tpu.memory_space<vmem>>, vector<1x8x8xf32>
    %75 = vector.shape_cast %74 : vector<1x8x8xf32> to vector<8x8xf32>
    %76 = arith.addf %64, %73 : vector<8x256xf32>
    %cst_60 = arith.constant dense<0.000000e+00> : vector<8x256xf32>
    %77 = tpu.matmul %75, %76, %cst_60 {dimension_numbers = #tpu.dot_dimension_numbers<[1], [0], [0], [1], [0, 0, 1, 1], [], []>} : vector<8x8xf32>, vector<8x256xf32>, vector<8x256xf32> -> vector<8x256xf32>
    %78 = arith.addf %54, %77 : vector<8x256xf32>
    %79 = math.absf %78 : vector<8x256xf32>
    %cst_61 = arith.constant 0.000000e+00 : f32
    %80 = vector.broadcast %cst_61 : f32 to vector<8x256xf32>
    %81 = arith.subf %80, %79 : vector<8x256xf32>
    %82 = math.exp %81 : vector<8x256xf32>
    %cst_62 = arith.constant 1.000000e+00 : f32
    %83 = vector.broadcast %cst_62 : f32 to vector<8x256xf32>
    %84 = arith.addf %83, %82 : vector<8x256xf32>
    %85 = tpu.reciprocal %84 {approx = true} : vector<8x256xf32> -> vector<8x256xf32>
    %cst_63 = arith.constant 0.000000e+00 : f32
    %86 = vector.broadcast %cst_63 : f32 to vector<8x256xf32>
    %87 = arith.cmpf oge, %78, %86 : vector<8x256xf32>
    %88 = arith.mulf %82, %85 : vector<8x256xf32>
    %89 = arith.select %87, %85, %88 : vector<8x256xi1>, vector<8x256xf32>
    %90 = arith.truncf %89 : vector<8x256xf32> to vector<8x256xbf16>
    %c0_64 = arith.constant 0 : index
    %c0_65 = arith.constant 0 : index
    %c0_66 = arith.constant 0 : index
    %91 = vector.load %arg8[%c0_64, %c0_65, %c0_66] : memref<1x8x256xbf16, #tpu.memory_space<vmem>>, vector<1x8x256xbf16>
    %92 = vector.shape_cast %91 : vector<1x8x256xbf16> to vector<8x256xbf16>
    %93 = vector.shape_cast %90 : vector<8x256xbf16> to vector<1x8x256xbf16>
    tpu.vector_store %arg8[%c0_64, %c0_65, %c0_66], %93 {strides = array<i32>} : memref<1x8x256xbf16, #tpu.memory_space<vmem>>, vector<1x8x256xbf16>,
    return
  }
  func.func @transform_0(%arg0: i32, %arg1: i32) -> (i32, i32, i32) {
    %c0_i32 = arith.constant 0 : i32
    %c0_i32_0 = arith.constant 0 : i32
    return %arg0, %c0_i32, %arg1 : i32, i32, i32
  }
  func.func @transform_1(%arg0: i32, %arg1: i32) -> (i32, i32, i32) {
    %c0_i32 = arith.constant 0 : i32
    %c0_i32_0 = arith.constant 0 : i32
    return %arg0, %c0_i32, %arg1 : i32, i32, i32
  }
  func.func @transform_2(%arg0: i32, %arg1: i32) -> (i32, i32, i32) {
    %c0_i32 = arith.constant 0 : i32
    %c0_i32_0 = arith.constant 0 : i32
    %c0_i32_1 = arith.constant 0 : i32
    %c0_i32_2 = arith.constant 0 : i32
    return %c0_i32, %c0_i32_0, %c0_i32_1 : i32, i32, i32
  }
  func.func @transform_3(%arg0: i32, %arg1: i32) -> (i32, i32, i32) {
    %c0_i32 = arith.constant 0 : i32
    %c0_i32_0 = arith.constant 0 : i32
    %c0_i32_1 = arith.constant 0 : i32
    %c0_i32_2 = arith.constant 0 : i32
    return %c0_i32, %c0_i32_0, %c0_i32_1 : i32, i32, i32
  }
  func.func @transform_4(%arg0: i32, %arg1: i32) -> (i32, i32, i32) {
    %c0_i32 = arith.constant 0 : i32
    %c0_i32_0 = arith.constant 0 : i32
    %c0_i32_1 = arith.constant 0 : i32
    %c0_i32_2 = arith.constant 0 : i32
    return %c0_i32, %c0_i32_0, %c0_i32_1 : i32, i32, i32
  }
  func.func @transform_5(%arg0: i32, %arg1: i32) -> (i32, i32) {
    %c0_i32 = arith.constant 0 : i32
    %c0_i32_0 = arith.constant 0 : i32
    %c0_i32_1 = arith.constant 0 : i32
    return %c0_i32, %c0_i32_0 : i32, i32
  }
  func.func @transform_6(%arg0: i32, %arg1: i32) -> (i32, i32, i32) {
    %c0_i32 = arith.constant 0 : i32
    %c0_i32_0 = arith.constant 0 : i32
    return %arg0, %c0_i32, %arg1 : i32, i32, i32
  }
}

</mosaic_0001>

<bundles_post_ra>
// kernel: spm_forward.1
= control target key start
LH: loop header
LB: loop body
LE: loop exit
PB: predicated region body
PF: predicated region fallthrough
CT: control target
= control target key end

     0   :  { %s1077_s21 = smov 0   ;;  %s1079_s22 = smov 0   ;;  %s1184_s0 = inlined_call_operand.vmem [shape: bf16[2,8,256], index: 0, kind: input, shape index: {}]   ;;  %s1185_s1 = inlined_call_operand.vmem [shape: bf16[2,8,256], index: 1, kind: input, shape index: {}]   ;;  %s1186_s2 = inlined_call_operand.vmem [shape: f32[6,8,8], index: 2, kind: input, shape index: {}]   ;;  %s1187_s3 = inlined_call_operand.vmem [shape: f32[6,8,1], index: 3, kind: input, shape index: {}]   ;;  %s1188_s4 = inlined_call_operand.vmem [shape: f32[3,8,8], index: 4, kind: input, shape index: {}]   ;;  %s1189_s5 = inlined_call_operand.vmem [shape: f32[8,1], index: 5, kind: input, shape index: {}]   ;;  %s1190_s6 = inlined_call_operand.vmem [shape: bf16[2,8,256], index: 6, kind: output, shape index: {}]  }
   0x1   :  { %s1081_s23 = smov 0  }
   0x2 LB: > { %s28_s24 = sadd.s32 1, %s1035_s22  ;;  %p939_p0 = scmp.ge.s32.totalorder %s1039_s23, 1  ;;  %s1039_s23 = sphi %s1081_s23, %s16_s23   ;;  %s1035_s22 = sphi %s1079_s22, %s1192_s22   ;;  %s1031_s21 = sphi %s1077_s21, %s1191_s21  }
   0x3   : > { %p30_p1 = scmp.ge.s32.totalorder %s28_s24, 2  ;;  %p250_p2 = scmp.lt.s32.totalorder %s1039_s23, 3 }
   0x5   : > { %s1194_s24 = smov (%p30_p1, %s28_s24), 0  ;;  %p251_p3 = pnand %p939_p0, %p250_p2 }
   0x6   : > { %p298_p4 = scmp.lt.s32.totalorder (!%p251_p3), %s1031_s21, 1 }
   0x7   : > { %254 = sbr.rel (%p251_p3) target bundleno = 605 (0x25d), region = 44 }
   0xc   : > { %v334_v0 = vld [vmem:[%s1187_s3] sm:$0xff]  ;;  %v1041_v1 = vmov 0   ;;  %s1196_s21 = smov (!%p298_p4, %s1031_s21), 1  ;;  %vm340_vm0 = vcmask 64512   ;;  %v948_v9 = vld [vmem:[%s1186_s2 + $0x18] sm:$0xff]  ;;  %v955_v12 = vld [vmem:[%s1187_s3 + $0x8] sm:$0xff] }
   0xd   : > { %1006 = vset.pattern.permute.xlu0 %v1041_v1  ;;  %1007 = vset.pattern.permute.xlu1 %v1041_v1  ;;  %s1098_s27 = sshll.u32 %s1196_s21, 3  ;;  %v333_v8 = vld [vmem:[%s1186_s2] sm:$0xff]  ;;  %v949_v10 = vld [vmem:[%s1187_s3 + $0x18] sm:$0xff]  ;;  %v954_v21 = vld [vmem:[%s1186_s2 + $0x8] sm:$0xff] }
   0xe   : > { %337 = vperm.xlu0 %1006, %v334_v0   ;;  %1008 = vset.pattern.permute.xlu2 %v1041_v1  ;;  %s305_s30 = scalar_lea.vmem %s1184_s0, %s1098_s27  ;;  %s315_s9 = scalar_lea.vmem %s1185_s1, %s1098_s27  ;;  %v443_v11 = vld [vmem:[%s1189_s5] sm:$0xff]  ;;  %v966_v33 = vld [vmem:[%s1187_s3 + $0x10] sm:$0xff]  ;;  %v970_v39 = vld [vmem:[%s1187_s3 + $0x28] sm:$0xff] }
   0xf   : > { %v327_v2 = vld [vmem:[%s305_s30] sm:$0xff]  ;;  %498 = vperm.xlu1 %1007, %v955_v12   ;;  %657 = vperm.xlu2 %1008, %v966_v33   ;;  %v965_v46 = vld [vmem:[%s1186_s2 + $0x10] sm:$0xff]  ;;  %v962_v56 = vld [vmem:[%s1188_s4 + $0x8] sm:$0xff]  ;;  %s325_s25 = scalar_lea.vmem %s1190_s6, %s1098_s27 }
  0x10   : > { %v328_v3 = vunpack.c.l.bf16 %v327_v2  ;;  %v329_v4 = vunpack.c.h.bf16 %v327_v2  ;;  %v330_v5 = vld [vmem:[%s315_s9] sm:$0xff]  ;;  %v969_v57 = vld [vmem:[%s1186_s2 + $0x28] sm:$0xff] }
  0x11   : > { %v331_v6 = vunpack.c.l.bf16 %v330_v5  ;;  %v332_v7 = vunpack.c.h.bf16 %v330_v5  ;;  %v959_v13 = vld [vmem:[%s1187_s3 + $0x20] sm:$0xff] }
  0x12   : > { %359 = vmatpush.msra.mxu0 %v328_v3  ;;  %379 = vmatpush.msra.mxu1 %v329_v4  ;;  %v440_v31 = vld [vmem:[%s1188_s4] sm:$0xff] }
  0x13   : > { %413 = vmatpush.msra.mxu2 %v331_v6  ;;  %433 = vmatpush.msra.mxu3 %v332_v7  ;;  %v958_v32 = vld [vmem:[%s1186_s2 + $0x20] sm:$0xff] }
  0x14   : > { %946 = vmatmul.msk.f32.vlgmr.msra.gmra.mxu0 %vm340_vm0, %v333_v8  ;;  %947 = vmatmul.msk.f32.vlgmr.msra.gmra.mxu1 %vm340_vm0, %v333_v8 }
  0x15   : > { %950 = vmatmul.msk.f32.vlgmr.msra.gmra.mxu2 %vm340_vm0, %v948_v9  ;;  %951 = vmatmul.msk.f32.vlgmr.msra.gmra.mxu3 %vm340_vm0, %v948_v9 }
  0x16   : > { %392 = vperm.xlu0 %1006, %v949_v10  }
  0x17   : > { %554 = vperm.xlu1 %1007, %v959_v13   ;;  %713 = vperm.xlu2 %1008, %v970_v39  }
  0x1e   : > { %446 = vperm.xlu0 %1006, %v443_v11  }
  0x69   : > { %v658_v59 = vpop.permute.xlu2 %657 }
  0x71   : > { %v714_v8 = vpop.permute.xlu2 %713 }
  0x80   : > { %v338_v14 = vpop.permute.xlu0 %337 }
  0x81   : > { %v499_v34 = vpop.permute.xlu1 %498 }
  0x88   : > { %v393_v22 = vpop.permute.xlu0 %392 }
  0x89   : > { %v555_v47 = vpop.permute.xlu1 %554 }
  0x90   : > { %v447_v58 = vpop.permute.xlu0 %446 }
  0x91   : > { %v361_v15 = vpop.f32.mrf.mxu0  ;;  %v381_v16 = vpop.f32.mrf.mxu1 }
  0x92   : > { %v362_v17 = vadd.f32 %v361_v15, %v338_v14  ;;  %v382_v18 = vadd.f32 %v381_v16, %v338_v14 }
  0x94   : > { %v384_v19 = vmax.f32 %v362_v17, 0.0  ;;  %v385_v20 = vmax.f32 %v382_v18, 0.0 }
  0x96   : > { %519 = vmatpush.msrb.mxu2 %v384_v19  ;;  %539 = vmatpush.msrb.mxu3 %v385_v20 }
  0x97   : > { %956 = vmatmul.msk.f32.vlgmr.msrb.gmra.mxu2 %vm340_vm0, %v954_v21  ;;  %957 = vmatmul.msk.f32.vlgmr.msrb.gmra.mxu3 %vm340_vm0, %v954_v21 }
  0x98   : > { %v415_v23 = vpop.f32.mrf.mxu2  ;;  %v435_v24 = vpop.f32.mrf.mxu3 }
  0x99   : > { %v416_v25 = vadd.f32 %v415_v23, %v393_v22  ;;  %v436_v26 = vadd.f32 %v435_v24, %v393_v22 }
  0x9b   : > { %v438_v27 = vmax.f32 %v416_v25, 0.0  ;;  %v439_v28 = vmax.f32 %v436_v26, 0.0 }
  0x9d   : > { %v441_v29 = vadd.f32 %v438_v27, %v384_v19  ;;  %v442_v30 = vadd.f32 %v439_v28, %v385_v20 }
  0x9f   : > { %467 = vmatpush.msrb.mxu0 %v441_v29  ;;  %487 = vmatpush.msrb.mxu1 %v442_v30 }
  0xa0   : > { %952 = vmatmul.msk.f32.vlgmr.msrb.gmra.mxu0 %vm340_vm0, %v440_v31  ;;  %953 = vmatmul.msk.f32.vlgmr.msrb.gmra.mxu1 %vm340_vm0, %v440_v31 }
  0xa1   : > { %575 = vmatpush.msra.mxu0 %v438_v27  ;;  %595 = vmatpush.msra.mxu1 %v439_v28 }
  0xa8   : > { %960 = vmatmul.msk.f32.vlgmr.msra.gmra.mxu0 %vm340_vm0, %v958_v32  ;;  %961 = vmatmul.msk.f32.vlgmr.msra.gmra.mxu1 %vm340_vm0, %v958_v32 }
 0x11a   : > { %v521_v35 = vpop.f32.mrf.mxu2  ;;  %v541_v36 = vpop.f32.mrf.mxu3 }
 0x11b   : > { %v522_v37 = vadd.f32 %v521_v35, %v499_v34  ;;  %v542_v38 = vadd.f32 %v541_v36, %v499_v34 }
 0x11d   : > { %v544_v40 = vmax.f32 %v522_v37, 0.0  ;;  %v545_v41 = vmax.f32 %v542_v38, 0.0  ;;  %v469_v42 = vpop.f32.mrf.mxu0  ;;  %v489_v43 = vpop.f32.mrf.mxu1 }
 0x11e   : > { %v470_v60 = vadd.f32 %v469_v42, %v447_v58  ;;  %v490_v61 = vadd.f32 %v489_v43, %v447_v58 }
 0x11f   : > { %v546_v44 = vadd.f32 %v544_v40, %v384_v19  ;;  %v547_v45 = vadd.f32 %v545_v41, %v385_v20  ;;  %v973_v19 = vld [vmem:[%s1188_s4 + $0x10] sm:$0xff] }
 0x121   : > { %678 = vmatpush.msrb.mxu0 %v546_v44  ;;  %698 = vmatpush.msrb.mxu1 %v547_v45 }
 0x122   : > { %967 = vmatmul.msk.f32.vlgmr.msrb.gmra.mxu0 %vm340_vm0, %v965_v46  ;;  %968 = vmatmul.msk.f32.vlgmr.msrb.gmra.mxu1 %vm340_vm0, %v965_v46 }
 0x125   : > { %v577_v48 = vpop.f32.mrf.mxu0  ;;  %v597_v49 = vpop.f32.mrf.mxu1 }
 0x126   : > { %v578_v50 = vadd.f32 %v577_v48, %v555_v47  ;;  %v598_v51 = vadd.f32 %v597_v49, %v555_v47 }
 0x128   : > { %v600_v52 = vmax.f32 %v578_v50, 0.0  ;;  %v601_v53 = vmax.f32 %v598_v51, 0.0 }
 0x12a   : > { %v604_v54 = vadd.f32 %v600_v52, %v546_v44  ;;  %v605_v55 = vadd.f32 %v601_v53, %v547_v45 }
 0x12c   : > { %624 = vmatpush.msra.mxu2 %v604_v54  ;;  %644 = vmatpush.msra.mxu3 %v605_v55 }
 0x12d   : > { %963 = vmatmul.msk.f32.vlgmr.msra.gmra.mxu2 %vm340_vm0, %v962_v56  ;;  %964 = vmatmul.msk.f32.vlgmr.msra.gmra.mxu3 %vm340_vm0, %v962_v56 }
 0x12e   : > { %734 = vmatpush.msrb.mxu2 %v600_v52  ;;  %754 = vmatpush.msrb.mxu3 %v601_v53 }
 0x135   : > { %971 = vmatmul.msk.f32.vlgmr.msrb.gmra.mxu2 %vm340_vm0, %v969_v57  ;;  %972 = vmatmul.msk.f32.vlgmr.msrb.gmra.mxu3 %vm340_vm0, %v969_v57 }
 0x19f   : > { %v680_v62 = vpop.f32.mrf.mxu0  ;;  %v700_v63 = vpop.f32.mrf.mxu1 }
 0x1a0   : > { %v681_v4 = vadd.f32 %v680_v62, %v658_v59  ;;  %v701_v5 = vadd.f32 %v700_v63, %v658_v59 }
 0x1a2   : > { %v703_v6 = vmax.f32 %v681_v4, 0.0  ;;  %v704_v7 = vmax.f32 %v701_v5, 0.0 }
 0x1a4   : > { %v705_v13 = vadd.f32 %v703_v6, %v546_v44  ;;  %v706_v14 = vadd.f32 %v704_v7, %v547_v45 }
 0x1b0   : > { %v626_v0 = vpop.f32.mrf.mxu2  ;;  %v646_v1 = vpop.f32.mrf.mxu3 }
 0x1b1   : > { %v649_v2 = vadd.f32 %v626_v0, %v470_v60  ;;  %v650_v3 = vadd.f32 %v646_v1, %v490_v61 }
 0x1b8   : > { %v736_v9 = vpop.f32.mrf.mxu2  ;;  %v756_v10 = vpop.f32.mrf.mxu3 }
 0x1b9   : > { %v737_v11 = vadd.f32 %v736_v9, %v714_v8  ;;  %v757_v12 = vadd.f32 %v756_v10, %v714_v8 }
 0x1bb   : > { %v759_v15 = vmax.f32 %v737_v11, 0.0  ;;  %v760_v16 = vmax.f32 %v757_v12, 0.0 }
 0x1bd   : > { %v763_v17 = vadd.f32 %v759_v15, %v705_v13  ;;  %v764_v18 = vadd.f32 %v760_v16, %v706_v14 }
 0x1bf   : > { %783 = vmatpush.msra.mxu0 %v763_v17  ;;  %803 = vmatpush.msra.mxu1 %v764_v18 }
 0x1c0   : > { %974 = vmatmul.msk.f32.vlgmr.msra.gmra.mxu0 %vm340_vm0, %v973_v19  ;;  %975 = vmatmul.msk.f32.vlgmr.msra.gmra.mxu1 %vm340_vm0, %v973_v19 }
 0x23d   : > { %v785_v20 = vpop.f32.mrf.mxu0  ;;  %v805_v21 = vpop.f32.mrf.mxu1 }
 0x23e   : > { %v808_v22 = vadd.f32 %v785_v20, %v649_v2  ;;  %v809_v23 = vadd.f32 %v805_v21, %v650_v3 }
 0x240   : > { %v810_v24 = vand.u32 2147483647, %v808_v22  ;;  %v811_v25 = vand.u32 2147483647, %v809_v23  ;;  %vm822_vm1 = vcmp.ge.f32.partialorder %v808_v22, 0.0  ;;  %vm823_vm2 = vcmp.ge.f32.partialorder %v809_v23, 0.0 }
 0x242   : > { %v812_v26 = vsub.f32 0.0, %v810_v24  ;;  %v813_v27 = vsub.f32 0.0, %v811_v25 }
 0x244   : > { %v814_v28 = vmul.f32 1.442695, %v812_v26  ;;  %v816_v29 = vmul.f32 1.442695, %v813_v27 }
 0x246   : > { %1009 = vpow2.f32 %v814_v28 }
 0x247   : > { %1011 = vpow2.f32 %v816_v29 }
 0x24c   : > { %v1010_v30 = vpop.eup %1009 }
 0x24d   : > { %v1012_v31 = vpop.eup %1011  ;;  %v818_v32 = vadd.f32 1.0, %v1010_v30 }
 0x24e   : > { %v819_v33 = vadd.f32 1.0, %v1012_v31 }
 0x24f   : > { %1013 = vrcp.f32 %v818_v32 }
 0x250   : > { %1015 = vrcp.f32 %v819_v33 }
 0x255   : > { %v1014_v34 = vpop.eup %1013 }
 0x256   : > { %v1016_v35 = vpop.eup %1015  ;;  %v824_v36 = vmul.f32 %v1014_v34, %v1010_v30 }
 0x257   : > { %v825_v37 = vmul.f32 %v1016_v35, %v1012_v31 }
 0x258   : > { %v826_v38 = vsel %vm822_vm1, %v1014_v34, %v824_v36 }
 0x259   : > { %v827_v39 = vsel %vm823_vm2, %v1016_v35, %v825_v37 }
 0x25a   : > { %v828_v40 = vpack.c.bf16 %v827_v39, %v826_v38 }
 0x25c   : > { %829 = vst [vmem:[%s325_s25] sm:$0xff] %v828_v40 }
 0x25d PF: > { %s16_s23 = sadd.s32 1, %s1039_s23   ;;  %s1191_s21 = smov %s1035_s22 }
 0x25e   : > { %p13_p5 = scmp.ge.s32.totalorder %s16_s23, 4   ;;  %s1192_s22 = smov %s1194_s24 }
 0x260   :  { %15 = sbr.rel (!%p13_p5) target bundleno = 2 (0x2), region = 89 }

</bundles_post_ra>
